<compile_context>
chip_gen: v5e
topology: v5e:2x2
jax: 0.10.0
libtpu: 0.0.40
codegen_flags: <defaults>
</compile_context>

<pallas_src>
import numpy as np

import jax
import jax.numpy as jnp
from jax.experimental import pallas as pl
from jax.experimental.pallas import tpu as pltpu


_MIN_LANES = 128                 # lane-dense stores / aligned column offsets
_SMALL_OUT_BYTES = 256 * 1024    # below this, XLA's fused concat wins
_MIN_GRID_STEPS = 4              # 2 TensorCores (v7x) x 2-deep double buffering
_MAX_ROW_TILE = 4096             # let the VMEM budget, not this cap, bound tm
_MIN_DMA_CHUNK_BYTES = 512       # per-row contiguous chunk for efficient DMA


# ---------------------------------------------------------------------------
# Hardware-derived VMEM budgets (v5e/v6e: 128 MiB, v7x: 64 MiB per TC).
# ---------------------------------------------------------------------------
def _vmem_budgets():
    cap = 64 * 1024 * 1024                         # conservative fallback (v7x)
    try:
        info = pltpu.get_tpu_info()
        c = getattr(info, "vmem_capacity_bytes", None)
        if c:
            cap = int(c)
    except Exception:
        pass
    vmem_limit = min(int(0.6 * cap), 64 * 1024 * 1024)   # 38.4 MiB v7x, 64 MiB v5e/v6e
    stage_budget = int(0.75 * vmem_limit) // 2           # x2 buffers in flight + headroom
    return stage_budget, vmem_limit


def _sublane_multiple(dtype):
    itemsize = jnp.dtype(dtype).itemsize
    return max(8, 32 // max(1, itemsize))          # 8 for f32, 16 for bf16, 32 for int8/fp8


def _pick_row_tile(rows, bytes_per_row, sublane, stage_budget):
    """Row tile that fits the per-stage VMEM budget and targets >= 4 grid steps."""
    tm_budget = max(1, stage_budget // max(1, bytes_per_row))
    tm_steps = max(1, rows // _MIN_GRID_STEPS)
    tm = int(min(rows, tm_budget, tm_steps, _MAX_ROW_TILE))
    if tm < rows:
        tm = max(sublane, (tm // sublane) * sublane)
        if tm > rows:
            tm = rows
    return tm


# ---------------------------------------------------------------------------
# Path A: row-tiled VMEM pipeline (many rows).  Casts to out dtype in-kernel.
# refs = (*in_refs, out_ref); in_ref_i is (TM, W_i), out_ref is (TM, sum W_i).
# ---------------------------------------------------------------------------
def _tiled_concat_kernel(*refs):
    out_ref = refs[-1]
    in_refs = refs[:-1]
    off = 0
    for r in in_refs:
        w = r.shape[-1]
        # static, 128-aligned offsets -> unmasked lane-dense stores; cast on VPU
        out_ref[:, off:off + w] = r[...].astype(out_ref.dtype)
        off += w


def _concat2d_tiled(xs_2d, out_w, dtype, tm, vmem_limit):
    rows = xs_2d[0].shape[0]
    grid = (pl.cdiv(rows, tm),)
    in_specs = [pl.BlockSpec((tm, x.shape[1]), lambda i: (i, 0)) for x in xs_2d]
    out_specs = pl.BlockSpec((tm, out_w), lambda i: (i, 0))
    return pl.pallas_call(
        _tiled_concat_kernel,
        out_shape=jax.ShapeDtypeStruct((rows, out_w), dtype),
        grid=grid,
        in_specs=in_specs,
        out_specs=out_specs,
        compiler_params=pltpu.CompilerParams(
            dimension_semantics=("parallel",),   # disjoint row blocks -> megacore OK
            vmem_limit_bytes=vmem_limit,
        ),
    )(*xs_2d)


# ---------------------------------------------------------------------------
# Path B: pure-DMA HBM->HBM concat (few / fat rows).  No VMEM staging at all:
# one strided async copy per input into its column window of the output.
# refs = (*in_hbm_refs, out_hbm_ref, dma_sems)
# ---------------------------------------------------------------------------
def _dma_concat_kernel(*refs):
    sem = refs[-1]
    out_ref = refs[-2]
    in_refs = refs[:-2]
    copies = []
    off = 0
    for i, r in enumerate(in_refs):
        w = r.shape[-1]
        cp = pltpu.make_async_copy(r, out_ref.at[:, off:off + w], sem.at[i])
        cp.start()
        copies.append(cp)
        off += w
    for cp in copies:            # start all, then wait all -> DMAs overlap
        cp.wait()


def _concat2d_dma(xs_2d, out_w, dtype):
    rows = xs_2d[0].shape[0]
    n = len(xs_2d)
    return pl.pallas_call(
        _dma_concat_kernel,
        out_shape=jax.ShapeDtypeStruct((rows, out_w), dtype),
        in_specs=[pl.BlockSpec(memory_space=pl.ANY) for _ in xs_2d],
        out_specs=pl.BlockSpec(memory_space=pl.ANY),
        scratch_shapes=[pltpu.SemaphoreType.DMA((n,))],
    )(*xs_2d)


# ---------------------------------------------------------------------------
# Wrapper: any-axis concat reduced to a 2-D last-axis concat via free reshapes.
# x_i : (pre..., C_i, post...) -> (prod(pre), C_i*prod(post)); row n of the
# output is the concatenation of row n of each input.
# ---------------------------------------------------------------------------
def concatenate(xs, dim=-1, *, force_pallas=False):
    """JAX/Pallas equivalent of GLCIC Concatenate(dim).forward(xs) == torch.cat(xs, dim)."""
    xs = list(xs)
    ndim = xs[0].ndim
    axis = dim % ndim
    out_dtype = jnp.result_type(*xs)               # match torch.cat dtype promotion
    itemsize_out = jnp.dtype(out_dtype).itemsize

    pre = xs[0].shape[:axis]
    post = xs[0].shape[axis + 1:]
    rows = int(np.prod(pre)) if pre else 1
    lpost = int(np.prod(post)) if post else 1
    widths = [x.shape[axis] * lpost for x in xs]
    out_w = sum(widths)
    out_shape = pre + (sum(x.shape[axis] for x in xs),) + post

    if rows == 0 or out_w == 0:
        return jnp.concatenate([x.astype(out_dtype) for x in xs], axis=axis)

    out_bytes = rows * out_w * itemsize_out
    if not force_pallas and (out_w < _MIN_LANES or out_bytes < _SMALL_OUT_BYTES):
        return jnp.concatenate(xs, axis=axis)      # tiny / lane-sparse: XLA wins

    stage_budget, vmem_limit = _vmem_budgets()
    sublane = max(_sublane_multiple(out_dtype),
                  *[_sublane_multiple(x.dtype) for x in xs])
    bytes_per_row = out_w * itemsize_out + sum(
        w * jnp.dtype(x.dtype).itemsize for x, w in zip(xs, widths))

    tm = _pick_row_tile(rows, bytes_per_row, sublane, stage_budget)
    grid_steps = pl.cdiv(rows, tm)
    lane_aligned = all(w % _MIN_LANES == 0 for w in widths)
    tiled_ok = (lane_aligned
                and grid_steps >= _MIN_GRID_STEPS
                and 2 * tm * bytes_per_row <= vmem_limit)

    if tiled_ok:
        # Many rows: pipelined, double-buffered, megacore-parallel VMEM copy;
        # dtype promotion happens inside the kernel (no extra HBM round trip).
        xs_2d = [x.reshape(rows, w) for x, w in zip(xs, widths)]
        out_2d = _concat2d_tiled(xs_2d, out_w, out_dtype, tm, vmem_limit)
        return out_2d.reshape(out_shape)

    dma_ok = all(w * itemsize_out >= _MIN_DMA_CHUNK_BYTES for w in widths)
    if dma_ok or force_pallas:
        # Few / fat rows (the real GLCIC case: rows == batch): strided HBM->HBM
        # DMAs, no VMEM budget concerns, no grid overhead.
        # DMA cannot cast, so widen mixed dtypes in the wrapper here.
        xs_2d = [x.astype(out_dtype).reshape(rows, w) for x, w in zip(xs, widths)]
        return _concat2d_dma(xs_2d, out_w, out_dtype).reshape(out_shape)

    return jnp.concatenate(xs, axis=axis)


if __name__ == "__main__":
    key = jax.random.PRNGKey(0)
    k1, k2, k3, k4, k5, k6, k7, k8 = jax.random.split(key, 8)

    # --- GLCIC-style channel concat (dim=1), NCHW, rows == batch -> pure-DMA path
    a = jax.random.normal(k1, (2, 4, 16, 16), dtype=jnp.float32)
    b = jax.random.normal(k2, (2, 4, 16, 16), dtype=jnp.float32)
    out_c = jax.block_until_ready(concatenate([a, b], dim=1, force_pallas=True))
    assert out_c.shape == (2, 8, 16, 16), out_c.shape
    assert jnp.array_equal(out_c, jnp.concatenate([a, b], axis=1))

    # --- last-dim concat: tiny lane width -> jnp fallback path
    out_w = jax.block_until_ready(concatenate([a, b], dim=-1))
    assert out_w.shape == (2, 4, 16, 32), out_w.shape
    assert jnp.array_equal(out_w, jnp.concatenate([a, b], axis=-1))

    # --- larger channel concat, still rows == 2 -> pure-DMA path by default gates
    c = jax.random.normal(k3, (2, 32, 32, 32), dtype=jnp.float32)
    d = jax.random.normal(k4, (2, 32, 32, 32), dtype=jnp.float32)
    out_big = jax.block_until_ready(concatenate([c, d], dim=1))
    assert out_big.shape == (2, 64, 32, 32), out_big.shape
    assert jnp.array_equal(out_big, jnp.concatenate([c, d], axis=1))

    # --- heterogeneous sizes along an inner spatial axis (dim=2) -> DMA path
    e = jax.random.normal(k5, (2, 4, 8, 16), dtype=jnp.float32)
    out_h = jax.block_until_ready(concatenate([e, a, b], dim=2, force_pallas=True))
    assert out_h.shape == (2, 4, 40, 16), out_h.shape
    assert jnp.array_equal(out_h, jnp.concatenate([e, a, b], axis=2))

    # --- many rows -> row-tiled VMEM pipeline (>= 4 parallel grid steps)
    f = jax.random.normal(k6, (64, 8, 16, 16), dtype=jnp.float32)
    g = jax.random.normal(k7, (64, 8, 16, 16), dtype=jnp.float32)
    out_t = jax.block_until_ready(concatenate([f, g], dim=1))
    assert out_t.shape == (64, 16, 16, 16), out_t.shape
    assert jnp.array_equal(out_t, jnp.concatenate([f, g], axis=1))

    # --- mixed dtypes: promotion happens inside the VMEM kernel
    p = jax.random.normal(k8, (64, 256), dtype=jnp.float32)
    q = jax.random.normal(k1, (64, 256), dtype=jnp.bfloat16)
    out_m = jax.block_until_ready(concatenate([p, q], dim=-1, force_pallas=True))
    assert out_m.shape == (64, 512), out_m.shape
    assert out_m.dtype == jnp.float32
    assert jnp.array_equal(out_m, jnp.concatenate([p, q.astype(jnp.float32)], axis=-1))

    print("KERNEL_OK")
</pallas_src>

<mosaic_0001>
module attributes {stable_mosaic.version = 11 : i64} {
  func.func @_dma_concat_kernel(%arg0: memref<2x1024xf32, #tpu.memory_space<any>>, %arg1: memref<2x1024xf32, #tpu.memory_space<any>>, %arg2: memref<2x2048xf32, #tpu.memory_space<any>>, %arg3: memref<2x!tpu.dma_semaphore, #tpu.memory_space<semaphore_mem>>) attributes {dimension_semantics = [], scalar_prefetch = 0 : i64, scratch_operands = 1 : i64, tpu.core_type = #tpu.core_type<tc>} {
    %c0_i32 = arith.constant 0 : i32
    %c0_i32_0 = arith.constant 0 : i32
    %c0_i32_1 = arith.constant 0 : i32
    %0 = tpu.memref_slice %arg2[%c0_i32_0, %c0_i32_1] : memref<2x2048xf32, #tpu.memory_space<any>> -> memref<2x1024xf32, #tpu.memory_space<any>>
    %1 = tpu.memref_slice %arg3[%c0_i32] : memref<2x!tpu.dma_semaphore, #tpu.memory_space<semaphore_mem>> -> memref<1x!tpu.dma_semaphore, #tpu.memory_space<semaphore_mem>>
    %2 = tpu.memref_squeeze %1 : memref<1x!tpu.dma_semaphore, #tpu.memory_space<semaphore_mem>> -> memref<!tpu.dma_semaphore, #tpu.memory_space<semaphore_mem>>
    tpu.enqueue_dma source(%arg0 : memref<2x1024xf32, #tpu.memory_space<any>>) target(%0 : memref<2x1024xf32, #tpu.memory_space<any>>) target_semaphore(%2 : memref<!tpu.dma_semaphore, #tpu.memory_space<semaphore_mem>>)
    %c1_i32 = arith.constant 1 : i32
    %c0_i32_2 = arith.constant 0 : i32
    %c1024_i32 = arith.constant 1024 : i32
    %3 = tpu.memref_slice %arg2[%c0_i32_2, %c1024_i32] : memref<2x2048xf32, #tpu.memory_space<any>> -> memref<2x1024xf32, #tpu.memory_space<any>>
    %4 = tpu.memref_slice %arg3[%c1_i32] : memref<2x!tpu.dma_semaphore, #tpu.memory_space<semaphore_mem>> -> memref<1x!tpu.dma_semaphore, #tpu.memory_space<semaphore_mem>>
    %5 = tpu.memref_squeeze %4 : memref<1x!tpu.dma_semaphore, #tpu.memory_space<semaphore_mem>> -> memref<!tpu.dma_semaphore, #tpu.memory_space<semaphore_mem>>
    tpu.enqueue_dma source(%arg1 : memref<2x1024xf32, #tpu.memory_space<any>>) target(%3 : memref<2x1024xf32, #tpu.memory_space<any>>) target_semaphore(%5 : memref<!tpu.dma_semaphore, #tpu.memory_space<semaphore_mem>>)
    %c0_i32_3 = arith.constant 0 : i32
    %c0_i32_4 = arith.constant 0 : i32
    %c0_i32_5 = arith.constant 0 : i32
    %6 = tpu.memref_slice %arg2[%c0_i32_4, %c0_i32_5] : memref<2x2048xf32, #tpu.memory_space<any>> -> memref<2x1024xf32, #tpu.memory_space<any>>
    %7 = tpu.memref_slice %arg3[%c0_i32_3] : memref<2x!tpu.dma_semaphore, #tpu.memory_space<semaphore_mem>> -> memref<1x!tpu.dma_semaphore, #tpu.memory_space<semaphore_mem>>
    %8 = tpu.memref_squeeze %7 : memref<1x!tpu.dma_semaphore, #tpu.memory_space<semaphore_mem>> -> memref<!tpu.dma_semaphore, #tpu.memory_space<semaphore_mem>>
    tpu.wait_dma2 semaphore(%8 : memref<!tpu.dma_semaphore, #tpu.memory_space<semaphore_mem>>) src(%arg0 : memref<2x1024xf32, #tpu.memory_space<any>>) dst(%6 : memref<2x1024xf32, #tpu.memory_space<any>>)
    %c1_i32_6 = arith.constant 1 : i32
    %c0_i32_7 = arith.constant 0 : i32
    %c1024_i32_8 = arith.constant 1024 : i32
    %9 = tpu.memref_slice %arg2[%c0_i32_7, %c1024_i32_8] : memref<2x2048xf32, #tpu.memory_space<any>> -> memref<2x1024xf32, #tpu.memory_space<any>>
    %10 = tpu.memref_slice %arg3[%c1_i32_6] : memref<2x!tpu.dma_semaphore, #tpu.memory_space<semaphore_mem>> -> memref<1x!tpu.dma_semaphore, #tpu.memory_space<semaphore_mem>>
    %11 = tpu.memref_squeeze %10 : memref<1x!tpu.dma_semaphore, #tpu.memory_space<semaphore_mem>> -> memref<!tpu.dma_semaphore, #tpu.memory_space<semaphore_mem>>
    tpu.wait_dma2 semaphore(%11 : memref<!tpu.dma_semaphore, #tpu.memory_space<semaphore_mem>>) src(%arg1 : memref<2x1024xf32, #tpu.memory_space<any>>) dst(%9 : memref<2x1024xf32, #tpu.memory_space<any>>)
    return
  }
}

</mosaic_0001>

<bundles_post_ra>
// kernel: tpu_custom_call.1
= control target key start
LH: loop header
LB: loop body
LE: loop exit
PB: predicated region body
PF: predicated region fallthrough
CT: control target
= control target key end

     0   :  { %s61_s18 = smov [#allocation2]   ;;  %s62_s19 = smov [#allocation3]   ;;  %s93_s0 = inlined_call_operand.hbm [shape: f32[2,1024], index: 0, kind: input, shape index: {}]   ;;  %s94_s2 = inlined_call_operand.hbm [shape: f32[2,2048], index: 2, kind: output, shape index: {}]   ;;  %s95_s1 = inlined_call_operand.hbm [shape: f32[2,1024], index: 1, kind: input, shape index: {}]  }
   0x1   :  { %s11_s11 = sshll.u32 %s93_s0, 4  ;;  %s13_s14 = sshll.u32 %s94_s2, 4  ;;  %s12_s11 = int_to_ptr.hbm [resolvable:$true] %s11_s11  ;;  %s14_s14 = int_to_ptr.hbm [resolvable:$true] %s13_s14 }
   0x2   :  { %s18_s17 = scalar_lea.hbm %s94_s2, 16  ;;  %s63_s20 = smov 0  }
   0x3   :  { %17 = dma.general %s12_s11, 256, %s14_s14, %s61_s18, %s62_s19, [#allocation4], %s63_s20, 0  }
   0x4   :  { %s26_s21 = sshll.u32 %s18_s17, 4  ;;  %s24_s24 = sshll.u32 %s95_s1, 4  ;;  %s25_s24 = int_to_ptr.hbm [resolvable:$true] %s24_s24  ;;  %s27_s21 = int_to_ptr.hbm [resolvable:$true] %s26_s21 }
   0x5   :  { %s64_s0 = smov [#allocation2 + $0x1]   ;;  %s65_s25 = smov [#allocation5]  }
   0x6   :  { %30 = dma.general %s25_s24, 256, %s27_s21, %s64_s0, %s65_s25, [#allocation6], %s63_s20, 0  }
   0x7   :  { %57 = dma.done.wait [#allocation2], 256 }
   0x8   :  { %58 = vsyncadd [#allocation2], 4294967040 }
   0x9   :  { %59 = dma.done.wait [#allocation2 + $0x1], 256 }
   0xa   :  { %60 = vsyncadd [#allocation2 + $0x1], 4294967040 }
   0xb   :  { %37 = vsyncmov [#allocation2] }
   0xe   :  { %s38_s2 = vpop.sfrf %37 }
   0xf   :  { %p50_p0 = scmp.ne.s32.totalorder %s38_s2, 0 }
  0x11   :  { %42 = shalt.err (%p50_p0)  }
  0x12   :  { %44 = vsyncmov [#allocation2 + $0x1] }
  0x15   :  { %s45_s26 = vpop.sfrf %44 }
  0x16   :  { %p51_p1 = scmp.ne.s32.totalorder %s45_s26, 0 }
  0x18   :  { %49 = shalt.err (%p51_p1)  }

</bundles_post_ra>
